<compile_context>
chip_gen: v7x
topology: tpu7x:2x2x1
jax: 0.10.0
libtpu: 0.0.40
codegen_flags: <defaults>
</compile_context>

<pallas_src>
import functools

import jax
import jax.numpy as jnp
from jax import lax
from jax.experimental import pallas as pl
from jax.experimental.pallas import tpu as pltpu


def _multi_attention_kernel(x1_ref, w_ref, x2_ref, o_ref, *, head_num, d, s2):
    # x1_ref: (1, S1, D)      -- batch b
    # w_ref : (D, H*D)        -- all heads, fused along lanes (VMEM-resident)
    # x2_ref: (1, S2, D)      -- batch b
    # o_ref : (1, S1, H*S2)   -- already in the torch.cat(dim=2) layout
    x1 = x1_ref[0]                      # (S1, D)
    w_all = w_ref[...]                  # (D, H*D)
    x2 = x2_ref[0]                      # (S2, D)

    # One wide MXU matmul across all heads.
    tmp = jnp.dot(x1, w_all, preferred_element_type=jnp.float32)   # (S1, H*D) f32

    # Per-head contraction against x2 on D (no explicit transpose), writing
    # each head's lane-dense slab of the concatenated output block.  H is a
    # small static count -> unrolled.
    for h in range(head_num):
        t_h = tmp[:, h * d:(h + 1) * d].astype(x2.dtype)           # feed MXU in input dtype
        o_h = lax.dot_general(
            t_h, x2,
            dimension_numbers=(((1,), (1,)), ((), ())),            # == t_h @ x2.T
            preferred_element_type=jnp.float32)                    # (S1, S2) f32
        o_ref[0, :, h * s2:(h + 1) * s2] = o_h.astype(o_ref.dtype)


def multi_attention(x1, x2, weights, *, compute_dtype=None, out_dtype=None):
    """x1: (B, S1, D), x2: (B, S2, D), weights: (H, D, D) -> (B, S1, H*S2)."""
    B, S1, D = x1.shape
    B2, S2, D2 = x2.shape
    H = weights.shape[0]
    assert B2 == B and D2 == D and weights.shape[1:] == (D, D)

    # Fuse heads once (layout prep, done by XLA outside the kernel):
    #   w_all[:, h*D:(h+1)*D] == weights[h]
    w_all = jnp.transpose(weights, (1, 0, 2)).reshape(D, H * D)

    if compute_dtype is not None:
        x1 = x1.astype(compute_dtype)
        x2 = x2.astype(compute_dtype)
        w_all = w_all.astype(compute_dtype)
    if out_dtype is None:
        out_dtype = x1.dtype

    kernel = functools.partial(_multi_attention_kernel, head_num=H, d=D, s2=S2)

    return pl.pallas_call(
        kernel,
        out_shape=jax.ShapeDtypeStruct((B, S1, H * S2), out_dtype),
        grid_spec=pltpu.PrefetchScalarGridSpec(
            num_scalar_prefetch=0,
            grid=(B,),
            in_specs=[
                pl.BlockSpec((1, S1, D), lambda b: (b, 0, 0)),     # x1[b]
                pl.BlockSpec((D, H * D), lambda b: (0, 0)),        # fused W, resident
                pl.BlockSpec((1, S2, D), lambda b: (b, 0, 0)),     # x2[b]
            ],
            out_specs=pl.BlockSpec((1, S1, H * S2), lambda b: (b, 0, 0)),
        ),
        compiler_params=pltpu.CompilerParams(
            dimension_semantics=("parallel",),
        ),
    )(x1, w_all, x2)


def _xavier_uniform_relu(key, shape):
    # xavier_uniform_ with gain = calculate_gain('relu') = sqrt(2)
    fan_in, fan_out = shape[-2], shape[-1]
    gain = jnp.sqrt(2.0)
    bound = gain * jnp.sqrt(6.0 / (fan_in + fan_out))
    return jax.random.uniform(key, shape, jnp.float32, -bound, bound)


def _reference(x1, x2, weights):
    preds = [x1 @ weights[h] @ jnp.swapaxes(x2, 1, 2) for h in range(weights.shape[0])]
    return jnp.concatenate(preds, axis=2)


if __name__ == "__main__":
    key = jax.random.PRNGKey(0)
    k1, k2, kw = jax.random.split(key, 3)

    # Small demo shapes.  S2 = 128 makes every per-head output slab a full
    # lane tile, so all stores are unmasked and lane-dense.
    B, S1, S2, D, H = 2, 8, 128, 32, 2

    x1 = jax.random.normal(k1, (B, S1, D), jnp.float32)
    x2 = jax.random.normal(k2, (B, S2, D), jnp.float32)
    weights = _xavier_uniform_relu(kw, (H, D, D))

    ref = _reference(x1, x2, weights)

    # f32 path: matches the PyTorch module numerics.
    out = multi_attention(x1, x2, weights)
    jax.block_until_ready(out)
    assert out.shape == (B, S1, H * S2), out.shape
    assert jnp.allclose(out, ref, atol=1e-4, rtol=1e-4), "f32 mismatch vs reference"

    # bf16 compute path (perf-review suggestion): half the DMA bytes,
    # full-rate MXU, f32 accumulation.  Checked with a loose tolerance.
    out_bf16 = multi_attention(x1, x2, weights, compute_dtype=jnp.bfloat16)
    jax.block_until_ready(out_bf16)
    assert out_bf16.shape == (B, S1, H * S2), out_bf16.shape
    assert out_bf16.dtype == jnp.bfloat16
    assert jnp.allclose(out_bf16.astype(jnp.float32), ref, atol=5e-1, rtol=5e-2), \
        "bf16 path diverged beyond loose tolerance"

    print("KERNEL_OK")
</pallas_src>

<mosaic_0001>
module attributes {stable_mosaic.version = 11 : i64} {
  func.func @_multi_attention_kernel(%arg0: i32, %arg1: memref<1x8x32xf32, #tpu.memory_space<vmem>>, %arg2: memref<32x64xf32, #tpu.memory_space<vmem>>, %arg3: memref<1x128x32xf32, #tpu.memory_space<vmem>>, %arg4: memref<1x8x256xf32, #tpu.memory_space<vmem>>) attributes {dimension_semantics = [#tpu.dimension_semantics<parallel>], iteration_bounds = array<i64: 2>, scalar_prefetch = 0 : i64, scratch_operands = 0 : i64, tpu.core_type = #tpu.core_type<tc>, window_params = [{transform_indices = @transform_0, window_bounds = array<i64: 1, 8, 32>}, {pipeline_mode = #tpu.pipeline_mode<synchronous>, transform_indices = @transform_1, window_bounds = array<i64: 32, 64>}, {transform_indices = @transform_2, window_bounds = array<i64: 1, 128, 32>}, {transform_indices = @transform_3, window_bounds = array<i64: 1, 8, 256>}]} {
    %c0 = arith.constant 0 : index
    %c0_0 = arith.constant 0 : index
    %c0_1 = arith.constant 0 : index
    %0 = vector.load %arg1[%c0, %c0_0, %c0_1] : memref<1x8x32xf32, #tpu.memory_space<vmem>>, vector<1x8x32xf32>
    %1 = vector.shape_cast %0 : vector<1x8x32xf32> to vector<8x32xf32>
    %c0_2 = arith.constant 0 : index
    %c0_3 = arith.constant 0 : index
    %2 = vector.load %arg2[%c0_2, %c0_3] : memref<32x64xf32, #tpu.memory_space<vmem>>, vector<32x64xf32>
    %c0_4 = arith.constant 0 : index
    %c0_5 = arith.constant 0 : index
    %c0_6 = arith.constant 0 : index
    %3 = vector.load %arg3[%c0_4, %c0_5, %c0_6] : memref<1x128x32xf32, #tpu.memory_space<vmem>>, vector<1x128x32xf32>
    %4 = vector.shape_cast %3 : vector<1x128x32xf32> to vector<128x32xf32>
    %cst = arith.constant dense<0.000000e+00> : vector<8x64xf32>
    %5 = tpu.matmul %1, %2, %cst {dimension_numbers = #tpu.dot_dimension_numbers<[1], [0], [0], [1], [0, 0, 1, 1], [], []>} : vector<8x32xf32>, vector<32x64xf32>, vector<8x64xf32> -> vector<8x64xf32>
    %6 = vector.extract_strided_slice %5 {offsets = [0, 0], sizes = [8, 32], strides = [1, 1]} : vector<8x64xf32> to vector<8x32xf32>
    %cst_7 = arith.constant dense<0.000000e+00> : vector<8x128xf32>
    %7 = tpu.matmul %6, %4, %cst_7 {dimension_numbers = #tpu.dot_dimension_numbers<[1], [1], [0], [0], [0, 0, 1, 0], [], []>} : vector<8x32xf32>, vector<128x32xf32>, vector<8x128xf32> -> vector<8x128xf32>
    %c0_8 = arith.constant 0 : index
    %c0_9 = arith.constant 0 : index
    %c0_10 = arith.constant 0 : index
    %8 = vector.load %arg4[%c0_8, %c0_9, %c0_10] : memref<1x8x256xf32, #tpu.memory_space<vmem>>, vector<1x8x128xf32>
    %9 = vector.shape_cast %8 : vector<1x8x128xf32> to vector<8x128xf32>
    %10 = vector.shape_cast %7 : vector<8x128xf32> to vector<1x8x128xf32>
    tpu.vector_store %arg4[%c0_8, %c0_9, %c0_10], %10 {strides = array<i32>} : memref<1x8x256xf32, #tpu.memory_space<vmem>>, vector<1x8x128xf32>,
    %11 = vector.extract_strided_slice %5 {offsets = [0, 32], sizes = [8, 32], strides = [1, 1]} : vector<8x64xf32> to vector<8x32xf32>
    %cst_11 = arith.constant dense<0.000000e+00> : vector<8x128xf32>
    %12 = tpu.matmul %11, %4, %cst_11 {dimension_numbers = #tpu.dot_dimension_numbers<[1], [1], [0], [0], [0, 0, 1, 0], [], []>} : vector<8x32xf32>, vector<128x32xf32>, vector<8x128xf32> -> vector<8x128xf32>
    %c0_12 = arith.constant 0 : index
    %c0_13 = arith.constant 0 : index
    %c128 = arith.constant 128 : index
    %13 = vector.load %arg4[%c0_12, %c0_13, %c128] : memref<1x8x256xf32, #tpu.memory_space<vmem>>, vector<1x8x128xf32>
    %14 = vector.shape_cast %13 : vector<1x8x128xf32> to vector<8x128xf32>
    %15 = vector.shape_cast %12 : vector<8x128xf32> to vector<1x8x128xf32>
    tpu.vector_store %arg4[%c0_12, %c0_13, %c128], %15 {strides = array<i32>} : memref<1x8x256xf32, #tpu.memory_space<vmem>>, vector<1x8x128xf32>,
    return
  }
  func.func @transform_0(%arg0: i32) -> (i32, i32, i32) {
    %c0_i32 = arith.constant 0 : i32
    %c0_i32_0 = arith.constant 0 : i32
    %c0_i32_1 = arith.constant 0 : i32
    return %arg0, %c0_i32, %c0_i32_0 : i32, i32, i32
  }
  func.func @transform_1(%arg0: i32) -> (i32, i32) {
    %c0_i32 = arith.constant 0 : i32
    %c0_i32_0 = arith.constant 0 : i32
    %c0_i32_1 = arith.constant 0 : i32
    return %c0_i32, %c0_i32_0 : i32, i32
  }
  func.func @transform_2(%arg0: i32) -> (i32, i32, i32) {
    %c0_i32 = arith.constant 0 : i32
    %c0_i32_0 = arith.constant 0 : i32
    %c0_i32_1 = arith.constant 0 : i32
    return %arg0, %c0_i32, %c0_i32_0 : i32, i32, i32
  }
  func.func @transform_3(%arg0: i32) -> (i32, i32, i32) {
    %c0_i32 = arith.constant 0 : i32
    %c0_i32_0 = arith.constant 0 : i32
    %c0_i32_1 = arith.constant 0 : i32
    return %arg0, %c0_i32, %c0_i32_0 : i32, i32, i32
  }
}

</mosaic_0001>

<bundles_post_ra>
// kernel: tpu_custom_call.1
= control target key start
LH: loop header
LB: loop body
LE: loop exit
PB: predicated region body
PF: predicated region fallthrough
CT: control target
= control target key end

     0   :  { %8 = vsyncpa [#allocation3], 0  ;;  %s1131_s0 = inlined_call_operand.vmem [shape: f32[2,8,32], index: 0, kind: input, shape index: {}]   ;;  %s1132_s1 = inlined_call_operand.vmem [shape: f32[32,64], index: 1, kind: input, shape index: {}]   ;;  %s1133_s2 = inlined_call_operand.vmem [shape: f32[2,128,32], index: 2, kind: input, shape index: {}]   ;;  %s1134_s3 = inlined_call_operand.hbm [shape: f32[2,8,256], index: 3, kind: output, shape index: {}]  }
   0x1   :  { %10 = vsyncpa [#allocation3 + $0x1], 0  ;;  %s936_s12 = smov 0   ;;  %s938_s13 = smov 0  }
   0x2   :  { %s940_s14 = smov 0   ;;  %s942_s15 = smov 0  }
   0x3 LB: > { %s957_s16 = sadd.s32 4294967295, %s909_s15   ;;  %s564_s17 = sadd.s32 4294967294, %s909_s15   ;;  %s909_s15 = sphi %s942_s15, %s1142_s15   ;;  %s905_s14 = sphi %s940_s14, %s1141_s14   ;;  %s901_s13 = sphi %s938_s13, %s1140_s13   ;;  %s897_s12 = sphi %s936_s12, %s1139_s12  }
   0x4   : > { %s961_s18 = sadd.s32 1, %s909_s15   ;;  %s96_s19 = sadd.s32 1, %s905_s14 }
   0x5   : > { %s93_s20 = ssub.s32 %s909_s15, %s961_s18  ;;  %p106_p0 = scmp.ne.s32.totalorder %s905_s14, %s901_s13 }
   0x6   : > { %p94_p1 = scmp.eq.s32.totalorder %s93_s20, 0  ;;  %p107_p2 = scmp.eq.s32.totalorder %s957_s16, 1 }
   0x7   : > { %p112_p3 = scmp.ne.s32.totalorder %s901_s13, %s897_s12  ;;  %p113_p4 = scmp.eq.s32.totalorder %s564_s17, 1 }
   0x8   : > { %s972_s21 = scalar_select %p94_p1, %s905_s14, %s96_s19  }
   0x9   : > { %p974_p5 = por %p107_p2, %p106_p0  ;;  %p978_p6 = por %p113_p4, %p112_p3 }
   0xa   : > { %p567_p7 = scmp.ge.s32.totalorder %s909_s15, 1  ;;  %p149_p8 = scmp.lt.s32.totalorder %s909_s15, 3 }
   0xc   : > { %p150_p9 = pnand %p567_p7, %p149_p8 }
   0xd   : > { %v187_v0 = vld [vmem:[%s1132_s1] sm:$0xff] (!%p150_p9)  ;;  %v188_v1 = vld [vmem:[%s1132_s1 + $0x8] sm:$0xff] (!%p150_p9)  ;;  %v189_v2 = vld [vmem:[%s1132_s1 + $0x10] sm:$0xff] (!%p150_p9)  ;;  %v911_v3 = vmov (!%p150_p9), 0.0|0.0   ;;  %vm912_vm0 = vmmov (!%p150_p9), 0   ;;  %v913_v6 = vmov (!%p150_p9), 0.0  }
   0xe   : > { %153 = sbr.rel (%p150_p9) target bundleno = 579 (0x243), region = 32  ;;  %734 = vmatprep.subr.bf16.mxu0 (!%p150_p9), %v911_v3  ;;  %v735_v4 = vpack.c.bf16 (!%p150_p9), %v188_v1, %v187_v0  ;;  %v190_v5 = vld [vmem:[%s1132_s1 + $0x18] sm:$0xff] (!%p150_p9)  ;;  %661 = vmatprep.mubr.msk.f32.mxu0 (!%p150_p9), %vm912_vm0, %v913_v6  ;;  %p177_p10 = scmp.lt.s32.totalorder (!%p150_p9), %s957_s16, 1  ;;  %vm207_vm1 = vcmask (!%p150_p9), 261120  }
   0xf   : > { %740 = vmatprep.subr.bf16.mxu1 (!%p150_p9), %v911_v3  ;;  %696 = vmatprep.mubr.msk.f32.mxu1 (!%p150_p9), %vm912_vm0, %v913_v6  ;;  %v738_v7 = vpack.c.bf16 (!%p150_p9), %v190_v5, %v189_v2  ;;  %vm1013_vm2 = vmpackc.low (!%p150_p9), %vm207_vm1, %vm207_vm1  ;;  %s914_s20 = smov (!%p150_p9), 96   ;;  %s174_s24 = sand.u32 (!%p150_p9), 1, %s901_s13  }
  0x10   : > { %736 = vmatpush3.bf16.msra.mxu0 (!%p150_p9), %v735_v4  ;;  %s568_s25 = sshll.u32 (!%p150_p9), %s174_s24, 4  ;;  %s613_s28 = sshll.u32 (!%p150_p9), %s957_s16, 8 }
  0x11   : > { %737 = vmatprep.subr.bf16.mxu0 (!%p150_p9), %v911_v3  ;;  %s176_s26 = scalar_lea.vmem (!%p150_p9), [#allocation2], %s568_s25  ;;  %s1091_s4 = scalar_lea.hbm (!%p150_p9), %s1134_s3, %s613_s28 }
  0x12   : > { %s493_s27 = sshll.u32 (!%p150_p9), %s176_s26, 4  ;;  %s1086_s27 = int_to_ptr.vmem [resolvable:$true] %s493_s27 }
  0x14   : > { %739 = vmatpush3.bf16.msra.mxu0 (!%p150_p9), %v738_v7 }
  0x15   : > { %s178_s5 = scalar_select %p177_p10, %s957_s16, 1  ;;  %772 = vmatprep.subr.bf16.mxu0 %v911_v3 }
  0x16   : > { %s915_s16 = smov [#allocation2]  }
  0x17   : > { %s569_s6 = sshll.u32 %s178_s5, 3  ;;  %s612_s7 = sshll.u32 %s178_s5, 7 }
  0x18   : > { %s180_s10 = scalar_lea.vmem %s1131_s0, %s569_s6  ;;  %s1009_s19 = scalar_lea.vmem %s1133_s2, %s612_s7 }
  0x19   : > { %v186_v9 = vld [vmem:[%s180_s10] sm:$0xff]  ;;  %v192_v11 = vld [vmem:[%s1009_s19 + $0x8] sm:$0xff]  ;;  %v193_v13 = vld [vmem:[%s1009_s19 + $0x10] sm:$0xff]  ;;  %s479_s5 = scalar_lea.sflag [#allocation3], %s174_s24  ;;  %s847_s6 = scalar_lea.vmem %s1086_s27, 256 }
  0x1a   : > { %v191_v10 = vld [vmem:[%s1009_s19] sm:$0xff]  ;;  %662 = vmatmul.mubr.msk.f32.vlgmr.msra.gmra.mrb[0].mxu0 %vm207_vm1, %v186_v9  ;;  %v194_v14 = vld [vmem:[%s1009_s19 + $0x18] sm:$0xff]  ;;  %v196_v17 = vld [vmem:[%s1009_s19 + $0x28] sm:$0xff]  ;;  %p848_p11 = scmp.ne.s32.totalorder %s1086_s27, %s847_s6  ;;  %s851_s7 = sshll.u32 %s915_s16, 4  ;;  %s852_s7 = int_to_ptr.vmem [resolvable:$false] %s851_s7 }
  0x1b   : > { %v741_v12 = vpack.c.bf16 %v192_v11, %v191_v10  ;;  %731 = vmatprep.mubr.msk.f32.mxu0 %vm912_vm0, %v913_v6  ;;  %v745_v15 = vpack.c.bf16 %v194_v14, %v193_v13  ;;  %v195_v16 = vld [vmem:[%s1009_s19 + $0x20] sm:$0xff]  ;;  %v197_v19 = vld [vmem:[%s1009_s19 + $0x30] sm:$0xff]  ;;  %v198_v20 = vld [vmem:[%s1009_s19 + $0x38] sm:$0xff]  ;;  %s853_s8 = scalar_lea.vmem %s852_s7, 512  ;;  %p854_p0 = scmp.lt.s32.totalorder %s1086_s27, %s852_s7 }
  0x1c   : > { %v749_v18 = vpack.c.bf16 %v196_v17, %v195_v16  ;;  %v753_v21 = vpack.c.bf16 %v198_v20, %v197_v19  ;;  %v199_v22 = vld [vmem:[%s1009_s19 + $0x40] sm:$0xff]  ;;  %v200_v23 = vld [vmem:[%s1009_s19 + $0x48] sm:$0xff]  ;;  %v201_v25 = vld [vmem:[%s1009_s19 + $0x50] sm:$0xff]  ;;  %p849_p12 = pnand %p848_p11, %p974_p5  ;;  %p855_p1 = scmp.lt.s32.totalorder %s853_s8, %s847_s6 }
  0x1d   : > { %743 = vmatpush3.bf16.xpose.msk.msra.mxu1 %vm1013_vm2, %v741_v12  ;;  %775 = vmatpush3.bf16.xpose.msk.msra.mxu0 %vm1013_vm2, %v741_v12  ;;  %v757_v24 = vpack.c.bf16 %v200_v23, %v199_v22  ;;  %v202_v26 = vld [vmem:[%s1009_s19 + $0x58] sm:$0xff]  ;;  %v203_v28 = vld [vmem:[%s1009_s19 + $0x60] sm:$0xff]  ;;  %v204_v29 = vld [vmem:[%s1009_s19 + $0x68] sm:$0xff] }
  0x1e   : > { %744 = vmatprep.subr.bf16.mxu1 %v911_v3  ;;  %776 = vmatprep.subr.bf16.mxu0 %v911_v3  ;;  %v761_v27 = vpack.c.bf16 %v202_v26, %v201_v25  ;;  %v765_v30 = vpack.c.bf16 %v204_v29, %v203_v28  ;;  %v205_v31 = vld [vmem:[%s1009_s19 + $0x70] sm:$0xff]  ;;  %v206_v32 = vld [vmem:[%s1009_s19 + $0x78] sm:$0xff]  ;;  %p850_p13 = pneg %p849_p12  ;;  %p856_p2 = por %p855_p1, %p854_p0 }
  0x1f   : > { %v769_v33 = vpack.c.bf16 %v206_v32, %v205_v31 }
  0x20   : > { %p857_p3 = pnand %p856_p2, %p850_p13 }
  0x25   : > { %747 = vmatpush3.bf16.xpose.msk.msra.mxu1 %vm1013_vm2, %v745_v15  ;;  %779 = vmatpush3.bf16.xpose.msk.msra.mxu0 %vm1013_vm2, %v745_v15 }
  0x26   : > { %748 = vmatprep.subr.bf16.mxu1 %v911_v3  ;;  %780 = vmatprep.subr.bf16.mxu0 %v911_v3 }
  0x2d   : > { %751 = vmatpush3.bf16.xpose.msk.msra.mxu1 %vm1013_vm2, %v749_v18  ;;  %783 = vmatpush3.bf16.xpose.msk.msra.mxu0 %vm1013_vm2, %v749_v18 }
  0x2e   : > { %752 = vmatprep.subr.bf16.mxu1 %v911_v3  ;;  %784 = vmatprep.subr.bf16.mxu0 %v911_v3 }
  0x35   : > { %755 = vmatpush3.bf16.xpose.msk.msra.mxu1 %vm1013_vm2, %v753_v21  ;;  %787 = vmatpush3.bf16.xpose.msk.msra.mxu0 %vm1013_vm2, %v753_v21 }
  0x36   : > { %756 = vmatprep.subr.bf16.mxu1 %v911_v3  ;;  %788 = vmatprep.subr.bf16.mxu0 %v911_v3 }
  0x3d   : > { %759 = vmatpush3.bf16.xpose.msk.msra.mxu1 %vm1013_vm2, %v757_v24  ;;  %791 = vmatpush3.bf16.xpose.msk.msra.mxu0 %vm1013_vm2, %v757_v24 }
  0x3e   : > { %760 = vmatprep.subr.bf16.mxu1 %v911_v3  ;;  %792 = vmatprep.subr.bf16.mxu0 %v911_v3 }
  0x45   : > { %763 = vmatpush3.bf16.xpose.msk.msra.mxu1 %vm1013_vm2, %v761_v27  ;;  %795 = vmatpush3.bf16.xpose.msk.msra.mxu0 %vm1013_vm2, %v761_v27 }
  0x46   : > { %764 = vmatprep.subr.bf16.mxu1 %v911_v3  ;;  %796 = vmatprep.subr.bf16.mxu0 %v911_v3 }
  0x4d   : > { %767 = vmatpush3.bf16.xpose.msk.msra.mxu1 %vm1013_vm2, %v765_v30  ;;  %799 = vmatpush3.bf16.xpose.msk.msra.mxu0 %vm1013_vm2, %v765_v30 }
  0x4e   : > { %768 = vmatprep.subr.bf16.mxu1 %v911_v3  ;;  %800 = vmatprep.subr.bf16.mxu0 %v911_v3 }
  0x55   : > { %771 = vmatpush3.bf16.xpose.msk.msra.mxu1 %vm1013_vm2, %v769_v33  ;;  %803 = vmatpush3.bf16.xpose.msk.msra.mxu0 %vm1013_vm2, %v769_v33 }
  0xed   : > { %v277_v34 = vpop.f32.mrb[0].mxu0 }
  0xee   : > { %v663_v35 = vpop.f32.mrb[1].mxu0  ;;  %697 = vmatmul.mubr.msk.f32.vlgmr.msra.gmra.mrb[0].mxu1 %vm207_vm1, %v277_v34  ;;  %403 = vrot.lane.b32.xlu0 %v277_v34, %s914_s20 }
 0x160   : > { %v404_v36 = vpop.permute.xlu0 %403 }
 0x161   : > { %732 = vmatmul.mubr.msk.f32.vlgmr.msra.gmra.mrb[2].mxu0 %vm207_vm1, %v404_v36 }
 0x1c1   : > { %v398_v37 = vpop.f32.mrb[0].mxu1 }
 0x1c2   : > { %402 = vst [vmem:[%s176_s26] sm:$0xff] %v398_v37  ;;  %v698_v38 = vpop.f32.mrb[1].mxu1 }
 0x234   : > { %v473_v39 = vpop.f32.mrb[2].mxu0 }
 0x235   : > { %477 = vst [vmem:[%s176_s26 + $0x8] sm:$0xff] %v473_v39  ;;  %v733_v40 = vpop.f32.mrb[3].mxu0 }
 0x236   : > { %860 = shalt.err (!%p857_p3)
}
 0x237   : > { %s861_s9 = scalar_lea.hbm %s1091_s4, 256  ;;  %s865_s17 = scalar_lea.hbm %s1134_s3, 512 }
 0x238   : > { %p862_p4 = scmp.ne.s32.totalorder %s1091_s4, %s861_s9  ;;  %p866_p9 = scmp.lt.u32.totalorder %s1091_s4, %s1134_s3 }
 0x239   : > { %p867_p10 = scmp.lt.u32.totalorder %s865_s17, %s861_s9  ;;  %p869_p12 = scmp.lt.u32.totalorder %s861_s9, %s1091_s4 }
 0x23a   : > { %p863_p7 = pnand %p862_p4, %p974_p5 }
 0x23b   : > { %p868_p11 = por %p867_p10, %p866_p9 }
 0x23c   : > { %p864_p8 = pneg %p863_p7 }
 0x23d   : > { %p870_p13 = por %p869_p12, %p868_p11 }
 0x23f   : > { %p871_p0 = pnand %p870_p13, %p864_p8 }
 0x241   : > { %874 = shalt.err (!%p871_p0)
}
 0x242   : > { %804 = dma.vmem_to_hbm [thread:$0]  (%p974_p5), %s1086_s27, 256, %s1091_s4, %s479_s5  }
 0x243 PF: > { %p810_p1 = scmp.ge.s32.totalorder %s909_s15, 2  ;;  %s505_s24 = sand.u32 1, %s897_s12  }
 0x244   : > { %s506_s25 = scalar_lea.sflag [#allocation3], %s505_s24 }
 0x245   : > { %p807_p2 = pnand %p810_p1, %p978_p6 }
 0x247   : > { %892 = dma.done.wait (!%p807_p2), %s506_s25, 256  }
 0x248   : > { %894 = vsyncadd (!%p807_p2), %s506_s25, 4294967040  ;;  %p13_p3 = scmp.ge.s32.totalorder %s961_s18, 4   ;;  %s1139_s12 = smov %s901_s13 }
 0x249   : > { %s1140_s13 = smov %s905_s14  ;;  %s1141_s14 = smov %s972_s21 }
 0x24a   : > { %s1142_s15 = smov %s961_s18  ;;  %15 = sbr.rel (!%p13_p3) target bundleno = 3 (0x3), region = 70 }
 0x251   :  { %511 = vsyncpa [#allocation3], 1 }
 0x252   :  { %513 = vsyncpa [#allocation3 + $0x1], 1 }

</bundles_post_ra>
